<compile_context>
chip_gen: v5e
topology: v5e:2x2
jax: 0.10.0
libtpu: 0.0.40
codegen_flags: <defaults>
</compile_context>

<pallas_src>
import functools

import jax
import jax.numpy as jnp
from jax.experimental import pallas as pl
from jax.experimental.pallas import tpu as pltpu

EPS = 1e-6  # Norm2d eps


# --------------------------- generation-aware sizing ------------------------

def _vmem_limit_bytes():
    """Scoped-VMEM limit with headroom, derived from the actual chip:
    ~96 MiB on v5e/v6e (128 MiB physical), ~48 MiB on v7x (64 MiB / TC)."""
    try:
        cap = pltpu.get_tpu_info().vmem_capacity_bytes
    except Exception:
        cap = 64 * 1024 * 1024  # conservative fallback
    return int(min(96 * 1024 * 1024, max(32 * 1024 * 1024, int(cap * 0.75))))


_VMEM_LIMIT = _vmem_limit_bytes()

_COMPILER_PARAMS = pltpu.CompilerParams(
    dimension_semantics=("parallel", "parallel"),  # batch x pixel tiles
    vmem_limit_bytes=_VMEM_LIMIT,
)


def _pixel_tiling(P, C, dtype):
    """Pick (pixel_tile, padded_P).

    The lane axis is pixels.  The tile is a multiple of 128 (or the full
    extent, which is exempt from the 128 rule), sized so double-buffered
    (C, TP) input + output blocks in `dtype` plus ~2 f32 temporaries fit well
    inside the scoped-VMEM limit.  Large P is tiled (never one giant block);
    tails are zero-padded and sliced off by the wrapper."""
    itemsize = jnp.dtype(dtype).itemsize
    per_col = C * (4 * itemsize + 8)          # 2x in + 2x out + ~2 f32 temps
    budget = int(_VMEM_LIMIT * 0.6)
    max_tp = max(128, (budget // per_col // 128) * 128)
    tp = int(min(max_tp, 2048))
    if P <= tp:
        return P, P                            # single full-extent block
    padded = ((P + tp - 1) // tp) * tp
    return tp, padded


# --------------------------------- kernel -----------------------------------

def _norm2d_kernel(x_ref, g_ref, b_ref, o_ref, *, eps):
    # x_ref: (1, C, TP) — channels on sublanes, pixels on lanes.
    x = x_ref[...].astype(jnp.float32)
    u = jnp.mean(x, axis=1, keepdims=True)                 # (1, 1, TP)  XLU
    d = x - u
    s = jnp.mean(d * d, axis=1, keepdims=True)             # biased variance
    y = d * jax.lax.rsqrt(s + eps)                         # rsqrt -> EUP slot
    y = y * g_ref[...] + b_ref[...]                        # (1, C, 1) broadcast
    o_ref[...] = y.astype(o_ref.dtype)


# -------------------------------- wrapper ------------------------------------

def norm2d(x_nchw, weight, bias, eps=EPS):
    """Norm2d forward: per-pixel LayerNorm over the channel dim of NCHW input.

    Matches the PyTorch module: u = mean_C(x); s = mean_C((x-u)^2);
    out = weight * (x-u)/sqrt(s+eps) + bias.  Output dtype == input dtype."""
    N, C, H, W = x_nchw.shape
    P = H * W
    TP, Pp = _pixel_tiling(P, C, x_nchw.dtype)

    x3 = x_nchw.reshape(N, C, P)
    if Pp != P:
        # zero-pad pixel tail (normalization is per-pixel; padded cols are
        # finite garbage and sliced off below — nothing is dropped).
        x3 = jnp.pad(x3, ((0, 0), (0, 0), (0, Pp - P)))

    g = weight.reshape(1, C, 1).astype(jnp.float32)
    b = bias.reshape(1, C, 1).astype(jnp.float32)

    out = pl.pallas_call(
        functools.partial(_norm2d_kernel, eps=eps),
        out_shape=jax.ShapeDtypeStruct((N, C, Pp), x_nchw.dtype),
        grid=(N, Pp // TP),
        in_specs=[
            pl.BlockSpec((1, C, TP), lambda n, p: (n, 0, p)),
            pl.BlockSpec((1, C, 1), lambda n, p: (0, 0, 0)),
            pl.BlockSpec((1, C, 1), lambda n, p: (0, 0, 0)),
        ],
        out_specs=pl.BlockSpec((1, C, TP), lambda n, p: (n, 0, p)),
        compiler_params=_COMPILER_PARAMS,
    )(x3, g, b)

    if Pp != P:
        out = out[:, :, :P]
    return out.reshape(N, C, H, W)


# plain-JAX reference (mirrors the PyTorch forward exactly)
def norm2d_ref(x, weight, bias, eps=EPS):
    x = x.astype(jnp.float32)
    u = jnp.mean(x, axis=1, keepdims=True)
    s = jnp.mean((x - u) ** 2, axis=1, keepdims=True)
    y = (x - u) / jnp.sqrt(s + eps)
    return weight[None, :, None, None] * y + bias[None, :, None, None]


# ----------------------------------- main ------------------------------------

if __name__ == "__main__":
    key = jax.random.PRNGKey(0)
    kx, kw, kb, kx2, kw2, kb2 = jax.random.split(key, 6)

    norm2d_jit = jax.jit(norm2d)

    # 1) small shape consistent with the module: (batch, channels, H, W), f32
    N, C, H, W = 2, 32, 16, 16
    x = jax.random.normal(kx, (N, C, H, W), jnp.float32)
    weight = 1.0 + 0.02 * jax.random.normal(kw, (C,), jnp.float32)
    bias = 0.02 * jax.random.normal(kb, (C,), jnp.float32)

    out = norm2d_jit(x, weight, bias)
    jax.block_until_ready(out)
    ref = norm2d_ref(x, weight, bias)
    assert out.shape == x.shape and out.dtype == x.dtype
    assert bool(jnp.all(jnp.isfinite(out)))
    assert bool(jnp.allclose(out, ref, rtol=1e-4, atol=1e-4)), \
        float(jnp.max(jnp.abs(out - ref)))

    # 2) a shape that exercises pixel tiling + tail padding, with bf16 I/O
    #    (halved HBM traffic; stats still computed in f32 inside the kernel).
    N2, C2, H2, W2 = 1, 64, 48, 48          # P = 2304 -> tiled + padded
    x2 = jax.random.normal(kx2, (N2, C2, H2, W2), jnp.float32)
    weight2 = 1.0 + 0.02 * jax.random.normal(kw2, (C2,), jnp.float32)
    bias2 = 0.02 * jax.random.normal(kb2, (C2,), jnp.float32)

    x2_bf16 = x2.astype(jnp.bfloat16)
    out2 = norm2d_jit(x2_bf16, weight2, bias2)
    jax.block_until_ready(out2)
    assert out2.shape == x2.shape and out2.dtype == jnp.bfloat16
    ref2 = norm2d_ref(x2_bf16.astype(jnp.float32), weight2, bias2)
    assert bool(jnp.all(jnp.isfinite(out2.astype(jnp.float32))))
    assert bool(jnp.allclose(out2.astype(jnp.float32), ref2,
                             rtol=5e-2, atol=5e-2)), \
        float(jnp.max(jnp.abs(out2.astype(jnp.float32) - ref2)))

    print("KERNEL_OK")
</pallas_src>

<mosaic_0001>
module attributes {stable_mosaic.version = 11 : i64} {
  func.func @_norm2d_kernel(%arg0: i32, %arg1: i32, %arg2: memref<1x32x256xf32, #tpu.memory_space<vmem>>, %arg3: memref<1x32x1xf32, #tpu.memory_space<vmem>>, %arg4: memref<1x32x1xf32, #tpu.memory_space<vmem>>, %arg5: memref<1x32x256xf32, #tpu.memory_space<vmem>>) attributes {dimension_semantics = [#tpu.dimension_semantics<parallel>, #tpu.dimension_semantics<parallel>], iteration_bounds = array<i64: 2, 1>, scalar_prefetch = 0 : i64, scratch_operands = 0 : i64, tpu.core_type = #tpu.core_type<tc>, window_params = [{transform_indices = @transform_0, window_bounds = array<i64: 1, 32, 256>}, {pipeline_mode = #tpu.pipeline_mode<synchronous>, transform_indices = @transform_1, window_bounds = array<i64: 1, 32, 1>}, {pipeline_mode = #tpu.pipeline_mode<synchronous>, transform_indices = @transform_2, window_bounds = array<i64: 1, 32, 1>}, {transform_indices = @transform_3, window_bounds = array<i64: 1, 32, 256>}]} {
    %c0 = arith.constant 0 : index
    %c0_0 = arith.constant 0 : index
    %c0_1 = arith.constant 0 : index
    %0 = vector.load %arg2[%c0, %c0_0, %c0_1] : memref<1x32x256xf32, #tpu.memory_space<vmem>>, vector<1x32x256xf32>
    %cst = arith.constant dense<0.000000e+00> : vector<1x256xf32>
    %1 = vector.multi_reduction <add>, %0, %cst [1] : vector<1x32x256xf32> to vector<1x256xf32>
    %2 = vector.shape_cast %1 : vector<1x256xf32> to vector<1x1x256xf32>
    %cst_2 = arith.constant 3.200000e+01 : f32
    %3 = vector.broadcast %cst_2 : f32 to vector<1x1x256xf32>
    %4 = arith.divf %2, %3 : vector<1x1x256xf32>
    %5 = vector.broadcast %4 : vector<1x1x256xf32> to vector<1x32x256xf32>
    %6 = arith.subf %0, %5 : vector<1x32x256xf32>
    %7 = arith.mulf %6, %6 : vector<1x32x256xf32>
    %cst_3 = arith.constant dense<0.000000e+00> : vector<1x256xf32>
    %8 = vector.multi_reduction <add>, %7, %cst_3 [1] : vector<1x32x256xf32> to vector<1x256xf32>
    %9 = vector.shape_cast %8 : vector<1x256xf32> to vector<1x1x256xf32>
    %cst_4 = arith.constant 3.200000e+01 : f32
    %10 = vector.broadcast %cst_4 : f32 to vector<1x1x256xf32>
    %11 = arith.divf %9, %10 : vector<1x1x256xf32>
    %cst_5 = arith.constant 9.99999997E-7 : f32
    %12 = vector.broadcast %cst_5 : f32 to vector<1x1x256xf32>
    %13 = arith.addf %11, %12 : vector<1x1x256xf32>
    %14 = math.rsqrt %13 : vector<1x1x256xf32>
    %15 = vector.broadcast %14 : vector<1x1x256xf32> to vector<1x32x256xf32>
    %16 = arith.mulf %6, %15 : vector<1x32x256xf32>
    %c0_6 = arith.constant 0 : index
    %c0_7 = arith.constant 0 : index
    %c0_8 = arith.constant 0 : index
    %17 = vector.load %arg3[%c0_6, %c0_7, %c0_8] : memref<1x32x1xf32, #tpu.memory_space<vmem>>, vector<1x32x1xf32>
    %18 = vector.broadcast %17 : vector<1x32x1xf32> to vector<1x32x256xf32>
    %19 = arith.mulf %16, %18 : vector<1x32x256xf32>
    %c0_9 = arith.constant 0 : index
    %c0_10 = arith.constant 0 : index
    %c0_11 = arith.constant 0 : index
    %20 = vector.load %arg4[%c0_9, %c0_10, %c0_11] : memref<1x32x1xf32, #tpu.memory_space<vmem>>, vector<1x32x1xf32>
    %21 = vector.broadcast %20 : vector<1x32x1xf32> to vector<1x32x256xf32>
    %22 = arith.addf %19, %21 : vector<1x32x256xf32>
    %c0_12 = arith.constant 0 : index
    %c0_13 = arith.constant 0 : index
    %c0_14 = arith.constant 0 : index
    %23 = vector.load %arg5[%c0_12, %c0_13, %c0_14] : memref<1x32x256xf32, #tpu.memory_space<vmem>>, vector<1x32x256xf32>
    tpu.vector_store %arg5[%c0_12, %c0_13, %c0_14], %22 {strides = array<i32>} : memref<1x32x256xf32, #tpu.memory_space<vmem>>, vector<1x32x256xf32>,
    return
  }
  func.func @transform_0(%arg0: i32, %arg1: i32) -> (i32, i32, i32) {
    %c0_i32 = arith.constant 0 : i32
    %c0_i32_0 = arith.constant 0 : i32
    return %arg0, %c0_i32, %arg1 : i32, i32, i32
  }
  func.func @transform_1(%arg0: i32, %arg1: i32) -> (i32, i32, i32) {
    %c0_i32 = arith.constant 0 : i32
    %c0_i32_0 = arith.constant 0 : i32
    %c0_i32_1 = arith.constant 0 : i32
    %c0_i32_2 = arith.constant 0 : i32
    return %c0_i32, %c0_i32_0, %c0_i32_1 : i32, i32, i32
  }
  func.func @transform_2(%arg0: i32, %arg1: i32) -> (i32, i32, i32) {
    %c0_i32 = arith.constant 0 : i32
    %c0_i32_0 = arith.constant 0 : i32
    %c0_i32_1 = arith.constant 0 : i32
    %c0_i32_2 = arith.constant 0 : i32
    return %c0_i32, %c0_i32_0, %c0_i32_1 : i32, i32, i32
  }
  func.func @transform_3(%arg0: i32, %arg1: i32) -> (i32, i32, i32) {
    %c0_i32 = arith.constant 0 : i32
    %c0_i32_0 = arith.constant 0 : i32
    return %arg0, %c0_i32, %arg1 : i32, i32, i32
  }
}

</mosaic_0001>

<bundles_post_ra>
// kernel: norm2d.1
= control target key start
LH: loop header
LB: loop body
LE: loop exit
PB: predicated region body
PF: predicated region fallthrough
CT: control target
= control target key end

     0   :  { %s564_s12 = smov 0   ;;  %s566_s13 = smov 0   ;;  %s668_s0 = inlined_call_operand.vmem [shape: f32[2,32,256], index: 0, kind: input, shape index: {}]   ;;  %s669_s1 = inlined_call_operand.vmem [shape: f32[1,32,1], index: 1, kind: input, shape index: {}]   ;;  %s670_s2 = inlined_call_operand.vmem [shape: f32[1,32,1], index: 2, kind: input, shape index: {}]   ;;  %s671_s3 = inlined_call_operand.vmem [shape: f32[2,32,256], index: 3, kind: output, shape index: {}]  }
   0x1   :  { %s568_s14 = smov 0  }
   0x2 LB: > { %s25_s15 = sadd.s32 1, %s536_s13  ;;  %p474_p0 = scmp.ge.s32.totalorder %s540_s14, 1  ;;  %s540_s14 = sphi %s568_s14, %s13_s14   ;;  %s536_s13 = sphi %s566_s13, %s673_s13   ;;  %s532_s12 = sphi %s564_s12, %s672_s12  }
   0x3   : > { %p27_p1 = scmp.ge.s32.totalorder %s25_s15, 2  ;;  %p158_p2 = scmp.lt.s32.totalorder %s540_s14, 3 }
   0x5   : > { %s675_s15 = smov (%p27_p1, %s25_s15), 0  ;;  %p159_p3 = pnand %p474_p0, %p158_p2 }
   0x6   : > { %p191_p4 = scmp.lt.s32.totalorder (!%p159_p3), %s532_s12, 1 }
   0x7   : > { %162 = sbr.rel (%p159_p3) target bundleno = 151 (0x97), region = 32 }
   0xc   : > { %v313_v0 = vld [vmem:[%s669_s1 + $0x10] sm:$0xff]  ;;  %v311_v1 = vld [vmem:[%s669_s1] sm:$0xff]  ;;  %v542_v2 = vmov 0   ;;  %v314_v4 = vld [vmem:[%s669_s1 + $0x18] sm:$0xff]  ;;  %s677_s12 = smov (!%p191_p4, %s532_s12), 1  ;;  %v543_v18 = vmov 32.0  }
   0xd   : > { %510 = vset.pattern.permute.xlu1 %v542_v2  ;;  %509 = vset.pattern.permute.xlu0 %v542_v2  ;;  %v343_v3 = vld [vmem:[%s670_s2] sm:$0xff]  ;;  %v312_v5 = vld [vmem:[%s669_s1 + $0x8] sm:$0xff]  ;;  %s481_s28 = sshll.u32 %s677_s12, 6  ;;  %v346_v7 = vld [vmem:[%s670_s2 + $0x18] sm:$0xff]  ;;  %512 = vrcp.f32 %v543_v18 }
   0xe   : > { %327 = vperm.xlu1 %510, %v313_v0   ;;  %317 = vperm.xlu0 %509, %v311_v1   ;;  %v344_v6 = vld [vmem:[%s670_s2 + $0x8] sm:$0xff]  ;;  %v345_v8 = vld [vmem:[%s670_s2 + $0x10] sm:$0xff]  ;;  %s198_s8 = scalar_lea.vmem %s668_s0, %s481_s28  ;;  %s643_s11 = scalar_lea.vmem %s671_s3, %s481_s28 }
   0xf   : > { %511 = vset.pattern.permute.xlu2 %v542_v2  ;;  %v210_v9 = vld [vmem:[%s198_s8] sm:$0xff]  ;;  %v211_v10 = vld [vmem:[%s198_s8 + $0x8] sm:$0xff]  ;;  %v212_v11 = vld [vmem:[%s198_s8 + $0x10] sm:$0xff] }
  0x10   : > { %349 = vperm.xlu2 %511, %v343_v3   ;;  %v213_v12 = vld [vmem:[%s198_s8 + $0x18] sm:$0xff]  ;;  %v218_v13 = vadd.f32 %v212_v11, %v210_v9  ;;  %v214_v14 = vld [vmem:[%s198_s8 + $0x20] sm:$0xff]  ;;  %v215_v15 = vld [vmem:[%s198_s8 + $0x28] sm:$0xff] }
  0x11   : > { %v227_v16 = vadd.f32 %v213_v12, %v211_v10  ;;  %v216_v19 = vld [vmem:[%s198_s8 + $0x30] sm:$0xff]  ;;  %v217_v20 = vld [vmem:[%s198_s8 + $0x38] sm:$0xff] }
  0x12   : > { %v219_v17 = vadd.f32 %v218_v13, %v214_v14 }
  0x13   : > { %v228_v21 = vadd.f32 %v227_v16, %v215_v15  ;;  %v513_v26 = vpop.eup %512 }
  0x14   : > { %v220_v22 = vadd.f32 %v219_v17, %v216_v19  ;;  %v237_v29 = vmul.f32 32.0, %v513_v26  ;;  %vm241_vm0 = vweird.f32 %v513_v26 }
  0x15   : > { %v229_v23 = vadd.f32 %v228_v21, %v217_v20 }
  0x16   : > { %332 = vperm.xlu1 %510, %v314_v4   ;;  %322 = vperm.xlu0 %509, %v312_v5   ;;  %v221_v24 = vrot.slane %v220_v22, 4  ;;  %v238_v32 = vsub.f32 1.0, %v237_v29 }
  0x17   : > { %v230_v25 = vrot.slane %v229_v23, 4 }
  0x18   : > { %354 = vperm.xlu2 %511, %v344_v6   ;;  %v222_v27 = vadd.f32 %v221_v24, %v220_v22  ;;  %v239_v35 = vmul.f32 %v513_v26, %v238_v32 }
  0x19   : > { %v231_v28 = vadd.f32 %v230_v25, %v229_v23 }
  0x1a   : > { %v223_v30 = vrot.slane %v222_v27, 2  ;;  %v240_v38 = vadd.f32 %v513_v26, %v239_v35 }
  0x1b   : > { %v232_v31 = vrot.slane %v231_v28, 2 }
  0x1c   : > { %v224_v33 = vadd.f32 %v223_v30, %v222_v27  ;;  %v242_v41 = vsel %vm241_vm0, %v513_v26, %v240_v38 }
  0x1d   : > { %v233_v34 = vadd.f32 %v232_v31, %v231_v28 }
  0x1e   : > { %364 = vperm.xlu1 %510, %v346_v7   ;;  %359 = vperm.xlu0 %509, %v345_v8   ;;  %v225_v36 = vrot.slane %v224_v33, 1 }
  0x1f   : > { %v234_v37 = vrot.slane %v233_v34, 1 }
  0x20   : > { %v226_v39 = vadd.f32 %v225_v36, %v224_v33 }
  0x21   : > { %v235_v40 = vadd.f32 %v234_v37, %v233_v34 }
  0x22   : > { %v243_v42 = vmul.f32 %v242_v41, %v226_v39 }
  0x23   : > { %v244_v43 = vmul.f32 %v242_v41, %v235_v40 }
  0x24   : > { %v245_v44 = vsub.f32 %v210_v9, %v243_v42  ;;  %v614_v45 = vsub.f32 %v212_v11, %v243_v42  ;;  %v618_v48 = vsub.f32 %v214_v14, %v243_v42  ;;  %v626_v54 = vsub.f32 %v216_v19, %v243_v42 }
  0x25   : > { %v246_v46 = vsub.f32 %v211_v10, %v244_v43  ;;  %v616_v47 = vsub.f32 %v213_v12, %v244_v43  ;;  %v620_v49 = vsub.f32 %v215_v15, %v244_v43  ;;  %v628_v55 = vsub.f32 %v217_v20, %v244_v43 }
  0x26   : > { %v253_v50 = vmul.f32 %v245_v44, %v245_v44  ;;  %v255_v51 = vmul.f32 %v614_v45, %v614_v45  ;;  %v257_v56 = vmul.f32 %v618_v48, %v618_v48  ;;  %v259_v60 = vmul.f32 %v626_v54, %v626_v54 }
  0x27   : > { %v254_v52 = vmul.f32 %v246_v46, %v246_v46  ;;  %v256_v53 = vmul.f32 %v616_v47, %v616_v47  ;;  %v258_v57 = vmul.f32 %v620_v49, %v620_v49  ;;  %v260_v61 = vmul.f32 %v628_v55, %v628_v55 }
  0x28   : > { %v261_v58 = vadd.f32 %v255_v51, %v253_v50 }
  0x29   : > { %v270_v59 = vadd.f32 %v256_v53, %v254_v52 }
  0x2a   : > { %v262_v62 = vadd.f32 %v261_v58, %v257_v56 }
  0x2b   : > { %v271_v63 = vadd.f32 %v270_v59, %v258_v57 }
  0x2c   : > { %v263_v0 = vadd.f32 %v262_v62, %v259_v60 }
  0x2d   : > { %v272_v1 = vadd.f32 %v271_v63, %v260_v61 }
  0x2e   : > { %v264_v2 = vrot.slane %v263_v0, 4 }
  0x2f   : > { %v273_v3 = vrot.slane %v272_v1, 4 }
  0x30   : > { %v265_v4 = vadd.f32 %v264_v2, %v263_v0 }
  0x31   : > { %v274_v5 = vadd.f32 %v273_v3, %v272_v1 }
  0x32   : > { %v266_v6 = vrot.slane %v265_v4, 2 }
  0x33   : > { %v275_v7 = vrot.slane %v274_v5, 2 }
  0x34   : > { %v267_v8 = vadd.f32 %v266_v6, %v265_v4 }
  0x35   : > { %v276_v9 = vadd.f32 %v275_v7, %v274_v5 }
  0x36   : > { %v268_v10 = vrot.slane %v267_v8, 1 }
  0x37   : > { %v277_v11 = vrot.slane %v276_v9, 1 }
  0x38   : > { %v269_v12 = vadd.f32 %v268_v10, %v267_v8 }
  0x39   : > { %v278_v13 = vadd.f32 %v277_v11, %v276_v9 }
  0x3a   : > { %v279_v14 = vmul.f32 %v269_v12, %v242_v41 }
  0x3b   : > { %v280_v15 = vmul.f32 %v278_v13, %v242_v41 }
  0x3c   : > { %v281_v16 = vadd.f32 1e-06, %v279_v14 }
  0x3d   : > { %v282_v17 = vadd.f32 1e-06, %v280_v15 }
  0x3e   : > { %514 = vrsqrt.f32 %v281_v16  ;;  %vm289_vm1 = vweird.f32 %v281_v16 }
  0x3f   : > { %516 = vrsqrt.f32 %v282_v17  ;;  %vm299_vm3 = vweird.f32 %v282_v17 }
  0x44   : > { %v515_v18 = vpop.eup %514 }
  0x45   : > { %v517_v19 = vpop.eup %516  ;;  %v284_v20 = vmul.f32 %v515_v18, %v281_v16  ;;  %vm290_vm2 = vweird.f32 %v515_v18 }
  0x46   : > { %v294_v21 = vmul.f32 %v517_v19, %v282_v17  ;;  %vm300_vm4 = vweird.f32 %v517_v19  ;;  %vm291_vm5 = vmor %vm289_vm1, %vm290_vm2 }
  0x47   : > { %v285_v22 = vmul.f32 %v515_v18, %v284_v20  ;;  %vm301_vm6 = vmor %vm299_vm3, %vm300_vm4 }
  0x48   : > { %v295_v23 = vmul.f32 %v517_v19, %v294_v21 }
  0x49   : > { %v286_v24 = vmul.f32 0.5, %v285_v22 }
  0x4a   : > { %v296_v25 = vmul.f32 0.5, %v295_v23 }
  0x4b   : > { %v287_v26 = vsub.f32 1.5, %v286_v24 }
  0x4c   : > { %v297_v27 = vsub.f32 1.5, %v296_v25 }
  0x4d   : > { %v288_v28 = vmul.f32 %v515_v18, %v287_v26 }
  0x4e   : > { %v298_v29 = vmul.f32 %v517_v19, %v297_v27 }
  0x4f   : > { %v292_v30 = vsel %vm291_vm5, %v515_v18, %v288_v28 }
  0x50   : > { %v302_v31 = vsel %vm301_vm6, %v517_v19, %v298_v29  ;;  %v303_v32 = vmul.f32 %v292_v30, %v245_v44  ;;  %v305_v41 = vmul.f32 %v292_v30, %v614_v45  ;;  %v307_v51 = vmul.f32 %v292_v30, %v618_v48 }
  0x51   : > { %v304_v33 = vmul.f32 %v302_v31, %v246_v46  ;;  %v306_v42 = vmul.f32 %v302_v31, %v616_v47  ;;  %v309_v53 = vmul.f32 %v292_v30, %v626_v54  ;;  %v310_v56 = vmul.f32 %v302_v31, %v628_v55 }
  0x52   : > { %v308_v45 = vmul.f32 %v302_v31, %v620_v49 }
  0x6a   : > { %v350_v34 = vpop.permute.xlu2 %349 }
  0x72   : > { %v355_v52 = vpop.permute.xlu2 %354 }
  0x80   : > { %v328_v35 = vpop.permute.xlu1 %327  ;;  %v318_v36 = vpop.permute.xlu0 %317 }
  0x81   : > { %v335_v37 = vmul.f32 %v318_v36, %v303_v32  ;;  %v336_v38 = vmul.f32 %v318_v36, %v304_v33  ;;  %v339_v47 = vmul.f32 %v328_v35, %v307_v51  ;;  %v340_v61 = vmul.f32 %v328_v35, %v308_v45 }
  0x83   : > { %v367_v39 = vadd.f32 %v350_v34, %v335_v37  ;;  %v368_v40 = vadd.f32 %v350_v34, %v336_v38 }
  0x85   : > { %375 = vst [vmem:[%s643_s11] sm:$0xff] %v367_v39 }
  0x86   : > { %376 = vst [vmem:[%s643_s11 + $0x8] sm:$0xff] %v368_v40 }
  0x88   : > { %v333_v43 = vpop.permute.xlu1 %332  ;;  %v323_v44 = vpop.permute.xlu0 %322 }
  0x89   : > { %v337_v46 = vmul.f32 %v323_v44, %v305_v41  ;;  %v338_v50 = vmul.f32 %v323_v44, %v306_v42  ;;  %v341_v59 = vmul.f32 %v333_v43, %v309_v53  ;;  %v342_v60 = vmul.f32 %v333_v43, %v310_v56 }
  0x8b   : > { %v369_v57 = vadd.f32 %v355_v52, %v337_v46  ;;  %v370_v58 = vadd.f32 %v355_v52, %v338_v50 }
  0x8d   : > { %377 = vst [vmem:[%s643_s11 + $0x10] sm:$0xff] %v369_v57 }
  0x8e   : > { %378 = vst [vmem:[%s643_s11 + $0x18] sm:$0xff] %v370_v58 }
  0x90   : > { %v365_v48 = vpop.permute.xlu1 %364  ;;  %v360_v62 = vpop.permute.xlu0 %359 }
  0x91   : > { %v373_v63 = vadd.f32 %v365_v48, %v341_v59  ;;  %v374_v54 = vadd.f32 %v365_v48, %v342_v60  ;;  %v371_v0 = vadd.f32 %v360_v62, %v339_v47  ;;  %v372_v55 = vadd.f32 %v360_v62, %v340_v61 }
  0x93   : > { %381 = vst [vmem:[%s643_s11 + $0x30] sm:$0xff] %v373_v63 }
  0x94   : > { %382 = vst [vmem:[%s643_s11 + $0x38] sm:$0xff] %v374_v54 }
  0x95   : > { %379 = vst [vmem:[%s643_s11 + $0x20] sm:$0xff] %v371_v0 }
  0x96   : > { %380 = vst [vmem:[%s643_s11 + $0x28] sm:$0xff] %v372_v55 }
  0x97 PF: > { %s13_s14 = sadd.s32 1, %s540_s14   ;;  %s672_s12 = smov %s536_s13 }
  0x98   : > { %p10_p5 = scmp.ge.s32.totalorder %s13_s14, 4   ;;  %s673_s13 = smov %s675_s15 }
  0x9a   :  { %12 = sbr.rel (!%p10_p5) target bundleno = 2 (0x2), region = 62 }

</bundles_post_ra>
